<compile_context>
chip_gen: v5e
topology: v5e:2x2
jax: 0.10.0
libtpu: 0.0.40
codegen_flags: <defaults>
</compile_context>

<pallas_src>
import jax
import jax.numpy as jnp
from jax.experimental import pallas as pl
from jax.experimental.pallas import tpu as pltpu

N_OUT = 256          # InitialBlock conv output channels
POOL_K = 3           # MaxPool1d kernel_size (PyTorch stride defaults to kernel_size)
POOL_PAD = POOL_K // 2
BN_EPS = 1e-5


def _acc_model_kernel(x_ref, w_ref, b_ref, wfc_ref, bfc_ref, out_ref):
    """Whole forward pass in a single invocation (no grid).

    x_ref   : (B, C_in, L)  NCW input, f32
    w_ref   : (C_in, 256)   conv1 weight with BN scale folded in, f32
    b_ref   : (1, 256)      conv1 bias + BN shift folded, f32
    wfc_ref : (256, n_pad)  FC weight zero-padded to a lane-dense width, bf16
    bfc_ref : (1, n_pad)    FC bias zero-padded, f32
    out_ref : (B, n_pad)    f32 logits (columns [0, num_classes) are valid)
    """
    B, C_in, L = x_ref.shape
    L_pool = (L + 2 * POOL_PAD - POOL_K) // POOL_K + 1

    # One small in-kernel transpose: NCW -> channels-last so the 256 conv outputs map to
    # the 128-lane axis for everything downstream.
    xt = jnp.transpose(x_ref[...], (0, 2, 1))                        # (B, L, C_in)

    # Conv1d(kernel_size=1) with BN folded into w/b.  K = C_in (=4) is far too shallow
    # to feed the MXU usefully, so use an unrolled per-channel VPU broadcast-FMA in f32.
    w = w_ref[...]                                                   # (C_in, 256)
    h = xt[:, :, 0:1] * w[0:1, :].reshape(1, 1, N_OUT)               # (B, L, 256)
    for c in range(1, C_in):                                         # static unroll
        h = h + xt[:, :, c:c + 1] * w[c:c + 1, :].reshape(1, 1, N_OUT)

    # MaxPool1d(k=3, s=3, pad=1) on the *linear* pre-activation.  Window i covers rows
    # {3i-1, 3i, 3i+1}; the -inf left pad makes window 0 = max(h[0], h[1]), which the
    # edge-replicated "previous row" shift reproduces with no masking.  No reshapes that
    # split the sublane axis -- just two shifted copies and elementwise max.
    h_prev = jnp.concatenate([h[:, :1, :], h[:, :-1, :]], axis=1)    # h[l-1] (edge-rep)
    h_next = jnp.concatenate([h[:, 1:, :], h[:, -1:, :]], axis=1)    # h[l+1] (edge-rep)
    wmax = jnp.maximum(jnp.maximum(h_prev, h), h_next)               # window max at start l

    # Per-channel bias/BN-shift and the monotone ReLU commute with the per-window max.
    act = jnp.maximum(wmax + b_ref[...].reshape(1, 1, N_OUT), 0.0)   # (B, L, 256)

    # GAP over the L_pool pooled positions == masked mean over rows with l % 3 == 0
    # (exactly L_pool such rows when L % 3 != 1; the wrapper guards that case).
    row = jax.lax.broadcasted_iota(jnp.int32, (1, L, N_OUT), 1)
    gap = jnp.sum(jnp.where(row % POOL_K == 0, act, 0.0), axis=1) * (1.0 / L_pool)

    # MultiKernel: SingleBlock.forward returns its input X unchanged -> identity on the
    # forward pass (dead compute, intentionally elided).

    # Linear(256, num_classes) on the MXU: bf16 operands, f32 accumulation; lane-dense
    # zero-padded output width so the store is a full unmasked vst.
    out = jnp.dot(gap.astype(jnp.bfloat16), wfc_ref[...],
                  preferred_element_type=jnp.float32) + bfc_ref[...]
    out_ref[...] = out.astype(out_ref.dtype)


def prepare_params(params):
    """Fold BatchNorm (inference stats) into the 1x1 conv and pad/cast the FC weights.

    Call ONCE per model; hoisted out of the forward path so the forward is a single
    pallas_call with no surrounding XLA prep ops."""
    scale = params["bn_gamma"] / jnp.sqrt(params["bn_var"] + BN_EPS)
    shift = params["bn_beta"] - params["bn_mean"] * scale
    w_fold = (params["conv1_w"] * scale[None, :]).astype(jnp.float32)          # (C_in, 256)
    b_fold = (params["conv1_b"] * scale + shift).reshape(1, N_OUT).astype(jnp.float32)

    wfc = params["fc_w"].astype(jnp.float32)                                   # (256, n_cls)
    bfc = params["fc_b"].astype(jnp.float32)
    num_classes = wfc.shape[1]
    n_pad = 128 * pl.cdiv(num_classes, 128)                                    # lane-dense
    wfc_pad = (jnp.zeros((N_OUT, n_pad), jnp.float32)
               .at[:, :num_classes].set(wfc)
               .astype(jnp.bfloat16))                                          # bf16 MXU operand
    bfc_pad = jnp.zeros((1, n_pad), jnp.float32).at[:, :num_classes].set(bfc)
    return {"w_fold": w_fold, "b_fold": b_fold, "wfc_pad": wfc_pad,
            "bfc_pad": bfc_pad, "num_classes": num_classes}


def acc_model_forward_padded(x_ncw, prep):
    """x_ncw: (B, C_in, L) f32 in native PyTorch NCW layout.

    Returns lane-padded logits (B, n_pad); columns [0, num_classes) are the outputs.
    Prefer this entry point and fuse the column slice into the consumer."""
    B, C_in, L = x_ncw.shape
    if L % POOL_K == 1:
        # TODO(synk): partial last pool window (L % 3 == 1) not handled in the fast path.
        raise NotImplementedError("L % 3 == 1 not supported")
    n_pad = prep["wfc_pad"].shape[1]
    vmem = pl.BlockSpec(memory_space=pltpu.MemorySpace.VMEM)
    return pl.pallas_call(
        _acc_model_kernel,
        out_shape=jax.ShapeDtypeStruct((B, n_pad), jnp.float32),
        in_specs=[vmem, vmem, vmem, vmem, vmem],
        out_specs=vmem,
    )(x_ncw.astype(jnp.float32), prep["w_fold"], prep["b_fold"],
      prep["wfc_pad"], prep["bfc_pad"])


def acc_model_forward(x_ncw, prep):
    """Convenience wrapper matching the PyTorch module's (B, num_classes) output."""
    return acc_model_forward_padded(x_ncw, prep)[:, :prep["num_classes"]]


def _reference(x_ncw, params):
    """Pure-JAX f32 reference of the same forward pass (for verification)."""
    x = jnp.transpose(x_ncw, (0, 2, 1)).astype(jnp.float32)
    h = jnp.einsum("blc,co->blo", x, params["conv1_w"]) + params["conv1_b"]
    scale = params["bn_gamma"] / jnp.sqrt(params["bn_var"] + BN_EPS)
    shift = params["bn_beta"] - params["bn_mean"] * scale
    h = jnp.maximum(h * scale + shift, 0.0)
    B, L, C = h.shape
    L_pool = (L + 2 * POOL_PAD - POOL_K) // POOL_K + 1
    right_pad = max(0, POOL_K * L_pool - (L + POOL_PAD))
    hp = jnp.pad(h, ((0, 0), (POOL_PAD, right_pad), (0, 0)))[:, : POOL_K * L_pool]
    pooled = hp.reshape(B, L_pool, POOL_K, C).max(axis=2)
    gap = pooled.mean(axis=1)
    return gap @ params["fc_w"] + params["fc_b"]


if __name__ == "__main__":
    B, C_IN, L, NUM_CLASSES = 2, 4, 48, 5

    key = jax.random.PRNGKey(0)
    ks = jax.random.split(key, 8)
    x = jax.random.normal(ks[0], (B, C_IN, L), jnp.float32)

    params = {
        "conv1_w": 0.1 * jax.random.normal(ks[1], (C_IN, N_OUT), jnp.float32),
        "conv1_b": 0.1 * jax.random.normal(ks[2], (N_OUT,), jnp.float32),
        "bn_gamma": 1.0 + 0.1 * jax.random.normal(ks[3], (N_OUT,), jnp.float32),
        "bn_beta": 0.1 * jax.random.normal(ks[4], (N_OUT,), jnp.float32),
        "bn_mean": 0.1 * jax.random.normal(ks[5], (N_OUT,), jnp.float32),
        "bn_var": jnp.abs(jax.random.normal(ks[6], (N_OUT,), jnp.float32)) + 0.5,
        "fc_w": 0.05 * jax.random.normal(ks[7], (N_OUT, NUM_CLASSES), jnp.float32),
        "fc_b": jnp.linspace(-0.1, 0.1, NUM_CLASSES).astype(jnp.float32),
    }

    prep = prepare_params(params)            # hoisted: once per model, not per forward
    out = acc_model_forward(x, prep)
    out = jax.block_until_ready(out)

    ref = _reference(x, params)
    assert out.shape == (B, NUM_CLASSES)
    # bf16 MXU operands on the FC (f32 accumulation) -> looser tolerance than pure f32.
    assert jnp.allclose(out, ref, atol=1e-2, rtol=1e-2), (out, ref)
    print("KERNEL_OK")
</pallas_src>

<mosaic_0001>
module attributes {stable_mosaic.version = 11 : i64} {
  func.func @_acc_model_kernel(%arg0: memref<2x4x48xf32, #tpu.memory_space<vmem>>, %arg1: memref<4x256xf32, #tpu.memory_space<vmem>>, %arg2: memref<1x256xf32, #tpu.memory_space<vmem>>, %arg3: memref<256x128xbf16, #tpu.memory_space<vmem>>, %arg4: memref<1x128xf32, #tpu.memory_space<vmem>>, %arg5: memref<2x128xf32, #tpu.memory_space<vmem>>) attributes {dimension_semantics = [], scalar_prefetch = 0 : i64, scratch_operands = 0 : i64, tpu.core_type = #tpu.core_type<tc>} {
    %c0 = arith.constant 0 : index
    %c0_0 = arith.constant 0 : index
    %c0_1 = arith.constant 0 : index
    %0 = vector.load %arg0[%c0, %c0_0, %c0_1] : memref<2x4x48xf32, #tpu.memory_space<vmem>>, vector<2x4x48xf32>
    %1 = tpu.transpose %0, [0, 2, 1] : vector<2x4x48xf32> -> vector<2x48x4xf32>
    %c0_2 = arith.constant 0 : index
    %c0_3 = arith.constant 0 : index
    %2 = vector.load %arg1[%c0_2, %c0_3] : memref<4x256xf32, #tpu.memory_space<vmem>>, vector<4x256xf32>
    %3 = vector.extract_strided_slice %1 {offsets = [0, 0, 0], sizes = [2, 48, 1], strides = [1, 1, 1]} : vector<2x48x4xf32> to vector<2x48x1xf32>
    %4 = vector.extract_strided_slice %2 {offsets = [0, 0], sizes = [1, 256], strides = [1, 1]} : vector<4x256xf32> to vector<1x256xf32>
    %5 = vector.shape_cast %4 : vector<1x256xf32> to vector<1x1x256xf32>
    %6 = vector.broadcast %3 : vector<2x48x1xf32> to vector<2x48x256xf32>
    %7 = vector.broadcast %5 : vector<1x1x256xf32> to vector<2x48x256xf32>
    %8 = arith.mulf %6, %7 : vector<2x48x256xf32>
    %9 = vector.extract_strided_slice %1 {offsets = [0, 0, 1], sizes = [2, 48, 1], strides = [1, 1, 1]} : vector<2x48x4xf32> to vector<2x48x1xf32>
    %10 = vector.extract_strided_slice %2 {offsets = [1, 0], sizes = [1, 256], strides = [1, 1]} : vector<4x256xf32> to vector<1x256xf32>
    %11 = vector.shape_cast %10 : vector<1x256xf32> to vector<1x1x256xf32>
    %12 = vector.broadcast %9 : vector<2x48x1xf32> to vector<2x48x256xf32>
    %13 = vector.broadcast %11 : vector<1x1x256xf32> to vector<2x48x256xf32>
    %14 = arith.mulf %12, %13 : vector<2x48x256xf32>
    %15 = arith.addf %8, %14 : vector<2x48x256xf32>
    %16 = vector.extract_strided_slice %1 {offsets = [0, 0, 2], sizes = [2, 48, 1], strides = [1, 1, 1]} : vector<2x48x4xf32> to vector<2x48x1xf32>
    %17 = vector.extract_strided_slice %2 {offsets = [2, 0], sizes = [1, 256], strides = [1, 1]} : vector<4x256xf32> to vector<1x256xf32>
    %18 = vector.shape_cast %17 : vector<1x256xf32> to vector<1x1x256xf32>
    %19 = vector.broadcast %16 : vector<2x48x1xf32> to vector<2x48x256xf32>
    %20 = vector.broadcast %18 : vector<1x1x256xf32> to vector<2x48x256xf32>
    %21 = arith.mulf %19, %20 : vector<2x48x256xf32>
    %22 = arith.addf %15, %21 : vector<2x48x256xf32>
    %23 = vector.extract_strided_slice %1 {offsets = [0, 0, 3], sizes = [2, 48, 1], strides = [1, 1, 1]} : vector<2x48x4xf32> to vector<2x48x1xf32>
    %24 = vector.extract_strided_slice %2 {offsets = [3, 0], sizes = [1, 256], strides = [1, 1]} : vector<4x256xf32> to vector<1x256xf32>
    %25 = vector.shape_cast %24 : vector<1x256xf32> to vector<1x1x256xf32>
    %26 = vector.broadcast %23 : vector<2x48x1xf32> to vector<2x48x256xf32>
    %27 = vector.broadcast %25 : vector<1x1x256xf32> to vector<2x48x256xf32>
    %28 = arith.mulf %26, %27 : vector<2x48x256xf32>
    %29 = arith.addf %22, %28 : vector<2x48x256xf32>
    %30 = vector.extract_strided_slice %29 {offsets = [0, 0, 0], sizes = [2, 1, 256], strides = [1, 1, 1]} : vector<2x48x256xf32> to vector<2x1x256xf32>
    %31 = vector.extract_strided_slice %29 {offsets = [0, 0, 0], sizes = [2, 47, 256], strides = [1, 1, 1]} : vector<2x48x256xf32> to vector<2x47x256xf32>
    %32 = tpu.concatenate %30, %31 in 1 : vector<2x1x256xf32>, vector<2x47x256xf32> -> vector<2x48x256xf32>
    %33 = vector.extract_strided_slice %29 {offsets = [0, 1, 0], sizes = [2, 47, 256], strides = [1, 1, 1]} : vector<2x48x256xf32> to vector<2x47x256xf32>
    %34 = vector.extract_strided_slice %29 {offsets = [0, 47, 0], sizes = [2, 1, 256], strides = [1, 1, 1]} : vector<2x48x256xf32> to vector<2x1x256xf32>
    %35 = tpu.concatenate %33, %34 in 1 : vector<2x47x256xf32>, vector<2x1x256xf32> -> vector<2x48x256xf32>
    %36 = arith.maximumf %32, %29 : vector<2x48x256xf32>
    %37 = arith.maximumf %36, %35 : vector<2x48x256xf32>
    %c0_4 = arith.constant 0 : index
    %c0_5 = arith.constant 0 : index
    %38 = vector.load %arg2[%c0_4, %c0_5] : memref<1x256xf32, #tpu.memory_space<vmem>>, vector<1x256xf32>
    %39 = vector.shape_cast %38 : vector<1x256xf32> to vector<1x1x256xf32>
    %40 = vector.broadcast %39 : vector<1x1x256xf32> to vector<2x48x256xf32>
    %41 = arith.addf %37, %40 : vector<2x48x256xf32>
    %cst = arith.constant 0.000000e+00 : f32
    %42 = vector.broadcast %cst : f32 to vector<2x48x256xf32>
    %43 = arith.maximumf %41, %42 : vector<2x48x256xf32>
    %44 = tpu.iota {dimensions = array<i32: 1>} : vector<1x48x256xi32>
    %c3_i32 = arith.constant 3 : i32
    %c0_i32 = arith.constant 0 : i32
    %45 = arith.cmpi eq, %c3_i32, %c0_i32 : i32
    %c1_i32 = arith.constant 1 : i32
    %46 = arith.select %45, %c1_i32, %c3_i32 : i32
    %47 = vector.broadcast %46 : i32 to vector<1x48x256xi32>
    %48 = arith.remsi %44, %47 : vector<1x48x256xi32>
    %c0_i32_6 = arith.constant 0 : i32
    %49 = vector.broadcast %c0_i32_6 : i32 to vector<1x48x256xi32>
    %50 = arith.cmpi ne, %48, %49 : vector<1x48x256xi32>
    %c0_i32_7 = arith.constant 0 : i32
    %51 = vector.broadcast %c0_i32_7 : i32 to vector<1x48x256xi32>
    %52 = arith.cmpi slt, %48, %51 : vector<1x48x256xi32>
    %c0_i32_8 = arith.constant 0 : i32
    %53 = arith.cmpi slt, %46, %c0_i32_8 : i32
    %54 = vector.broadcast %53 : i1 to vector<1x48x256xi1>
    %55 = vector.broadcast %54 : vector<1x48x256xi1> to vector<1x48x256xi1>
    %56 = arith.xori %52, %55 : vector<1x48x256xi1>
    %57 = arith.andi %56, %50 : vector<1x48x256xi1>
    %58 = vector.broadcast %46 : i32 to vector<1x48x256xi32>
    %59 = arith.addi %48, %58 : vector<1x48x256xi32>
    %60 = arith.select %57, %59, %48 : vector<1x48x256xi1>, vector<1x48x256xi32>
    %c0_i32_9 = arith.constant 0 : i32
    %61 = vector.broadcast %c0_i32_9 : i32 to vector<1x48x256xi32>
    %62 = arith.cmpi eq, %60, %61 : vector<1x48x256xi32>
    %cst_10 = arith.constant 0.000000e+00 : f32
    %63 = vector.shape_cast %62 : vector<1x48x256xi1> to vector<1x48x256xi1>
    %64 = vector.broadcast %63 : vector<1x48x256xi1> to vector<2x48x256xi1>
    %65 = vector.broadcast %cst_10 : f32 to vector<2x48x256xf32>
    %66 = arith.select %64, %43, %65 : vector<2x48x256xi1>, vector<2x48x256xf32>
    %cst_11 = arith.constant dense<0.000000e+00> : vector<2x256xf32>
    %67 = vector.multi_reduction <add>, %66, %cst_11 [1] : vector<2x48x256xf32> to vector<2x256xf32>
    %cst_12 = arith.constant 6.250000e-02 : f32
    %68 = vector.broadcast %cst_12 : f32 to vector<2x256xf32>
    %69 = arith.mulf %67, %68 : vector<2x256xf32>
    %70 = arith.truncf %69 : vector<2x256xf32> to vector<2x256xbf16>
    %c0_13 = arith.constant 0 : index
    %c0_14 = arith.constant 0 : index
    %71 = vector.load %arg3[%c0_13, %c0_14] : memref<256x128xbf16, #tpu.memory_space<vmem>>, vector<256x128xbf16>
    %cst_15 = arith.constant dense<0.000000e+00> : vector<2x128xf32>
    %72 = tpu.matmul %70, %71, %cst_15 {dimension_numbers = #tpu.dot_dimension_numbers<[1], [0], [0], [1], [0, 0, 1, 1], [], []>} : vector<2x256xbf16>, vector<256x128xbf16>, vector<2x128xf32> -> vector<2x128xf32>
    %c0_16 = arith.constant 0 : index
    %c0_17 = arith.constant 0 : index
    %73 = vector.load %arg4[%c0_16, %c0_17] : memref<1x128xf32, #tpu.memory_space<vmem>>, vector<1x128xf32>
    %74 = vector.broadcast %73 : vector<1x128xf32> to vector<2x128xf32>
    %75 = arith.addf %72, %74 : vector<2x128xf32>
    %c0_18 = arith.constant 0 : index
    %c0_19 = arith.constant 0 : index
    %76 = vector.load %arg5[%c0_18, %c0_19] : memref<2x128xf32, #tpu.memory_space<vmem>>, vector<2x128xf32>
    tpu.vector_store %arg5[%c0_18, %c0_19], %75 {strides = array<i32>} : memref<2x128xf32, #tpu.memory_space<vmem>>, vector<2x128xf32>,
    return
  }
}

</mosaic_0001>

<bundles_post_ra>
// kernel: tpu_custom_call.1
= control target key start
LH: loop header
LB: loop body
LE: loop exit
PB: predicated region body
PF: predicated region fallthrough
CT: control target
= control target key end

     0   :  { %10 = vsyncpa [#allocation3], 0  ;;  %s2530_s0 = inlined_call_operand.hbm [shape: f32[2,4,48], index: 0, kind: input, shape index: {}]   ;;  %s2531_s1 = inlined_call_operand.hbm [shape: f32[4,256], index: 1, kind: input, shape index: {}]   ;;  %s2532_s2 = inlined_call_operand.hbm [shape: f32[1,256], index: 2, kind: input, shape index: {}]   ;;  %s2533_s3 = inlined_call_operand.hbm [shape: bf16[256,128], index: 3, kind: input, shape index: {}]   ;;  %s2534_s4 = inlined_call_operand.vmem [shape: f32[1,128], index: 4, kind: input, shape index: {}]   ;;  %s2535_s5 = inlined_call_operand.hbm [shape: f32[2,128], index: 5, kind: output, shape index: {}]  }
   0x1   :  { %11 = vsyncpa [#allocation6], 0 }
   0x2   :  { %12 = vsyncpa [#allocation9], 0  ;;  %s32_s20 = sshll.u32 %s2531_s1, 4  ;;  %s33_s20 = int_to_ptr.hbm [resolvable:$true] %s32_s20 }
   0x3   :  { %13 = vsyncpa [#allocation4], 0  ;;  %s1572_s21 = smov [#allocation5]   ;;  %s18_s25 = sshll.u32 %s2530_s0, 4  ;;  %s19_s25 = int_to_ptr.hbm [resolvable:$true] %s18_s25 }
   0x4   :  { %s34_s22 = sshll.u32 %s1572_s21, 4  ;;  %s1573_s26 = smov [#allocation2]   ;;  %s35_s22 = int_to_ptr.vmem [resolvable:$true] %s34_s22 }
   0x5   :  { %37 = dma.hbm_to_vmem [thread:$0]  %s33_s20, 128, %s35_s22, [#allocation6]  }
   0x6   :  { %s20_s27 = sshll.u32 %s1573_s26, 4  ;;  %s1574_s28 = smov 64   ;;  %s21_s27 = int_to_ptr.vmem [resolvable:$true] %s20_s27 }
   0x7   :  { %s1575_s29 = smov 4   ;;  %s43_s1 = sshll.u32 %s2532_s2, 4  ;;  %s44_s1 = int_to_ptr.hbm [resolvable:$true] %s43_s1 }
   0x8   :  { %26 = dma.hbm_to_vmem [thread:$0]  %s19_s25, 128, %s21_s27, [#allocation3], %s1574_s28, %s1574_s28, %s1575_s29  }
   0x9   :  { %s1576_s7 = smov [#allocation7]   ;;  %s53_s0 = sshll.u32 %s2533_s3, 4  ;;  %s54_s0 = int_to_ptr.hbm [resolvable:$true] %s53_s0 }
   0xa   :  { %s45_s8 = sshll.u32 %s1576_s7, 4  ;;  %s1577_s11 = smov [#allocation8]   ;;  %s46_s8 = int_to_ptr.vmem [resolvable:$true] %s45_s8 }
   0xb   :  { %48 = dma.hbm_to_vmem [thread:$0]  %s44_s1, 32, %s46_s8, [#allocation6]  }
   0xc   :  { %s55_s12 = sshll.u32 %s1577_s11, 4  ;;  %s56_s12 = int_to_ptr.vmem [resolvable:$true] %s55_s12 }
   0xd   :  { %61 = dma.hbm_to_vmem [thread:$0]  %s54_s0, 2048, %s56_s12, [#allocation9], %s1574_s28, %s1574_s28, %s1575_s29  }
   0xe   :  { %1564 = dma.done.wait [#allocation3], 128  }
   0xf   :  { %1565 = vsyncadd [#allocation3], 4294967168 }
  0x10   :  { %1566 = dma.done.wait [#allocation6], 160  }
  0x11   :  { %1567 = vsyncadd [#allocation6], 4294967136 }
  0x12   :  { %1568 = dma.done.wait [#allocation9], 2048  }
  0x13   :  { %1569 = vsyncadd [#allocation9], 4294965248  ;;  %v80_v0 = vld [vmem:[#allocation2] sm:$0xf]  ;;  %v1578_v1 = vmov 1   ;;  %v2538_v2 = vmov 0  }
  0x14   :  { %82 = vxpose.xlu0.b32.start.end [1/1] (short) (narrow) %v80_v0, 48  ;;  %1407 = vset.pattern.permute.xlu2 %v1578_v1  ;;  %v81_v3 = vld [vmem:[#allocation2 + $0x4] sm:$0xf]  ;;  %v1580_v12 = vmov 2   ;;  %v1672_v14 = vld [vmem:[#allocation5] sm:$0xff]  ;;  %v1581_v20 = vmov 3  }
  0x15   :  { %1406 = vset.pattern.permute.xlu1 %v2538_v2  ;;  %v286_v15 = vperm.slane %v1672_v14, 1  ;;  %v287_v17 = vperm.slane %v1672_v14, 5  ;;  %v208_v18 = vperm.slane %v1672_v14, 0  ;;  %v209_v19 = vperm.slane %v1672_v14, 4  ;;  %s1582_s13 = smov [#allocation10]   ;;  %s1302_s17 = sshll.u32 %s2535_s5, 4  ;;  %s1303_s17 = int_to_ptr.hbm [resolvable:$true] %s1302_s17 }
  0x16   :  { %v388_v46 = vperm.slane %v1672_v14, 2  ;;  %v389_v47 = vperm.slane %v1672_v14, 6  ;;  %vm568_vm6 = vcmask 1040384   ;;  %vm641_vm7 = vcmask 1046528   ;;  %s1300_s14 = sshll.u32 %s1582_s13, 4  ;;  %s1301_s14 = int_to_ptr.vmem [resolvable:$true] %s1300_s14 }
  0x17   :  { %v1683_v21 = vperm.slane %v286_v15, 1  ;;  %v1685_v22 = vperm.slane %v287_v17, 1  ;;  %v1687_v23 = vperm.slane %v208_v18, 0  ;;  %v1689_v24 = vperm.slane %v209_v19, 0 }
  0x18   :  { %v1734_v50 = vperm.slane %v388_v46, 2  ;;  %v1736_v51 = vperm.slane %v389_v47, 2 }
  0x19   :  { %2553 = vst [vmem:[#allocation15_spill] sm:$0xff] %v1687_v23 }
  0x1a   :  { %2554 = vst [vmem:[#allocation16_spill] sm:$0xff] %v1689_v24 }
  0x44   :  { %114 = vxpose.xlu0.b32.start.end [1/1] (short) (narrow) %v81_v3, 48 }
  0xab   :  { %1410 = vset.pattern.permute.xlu0 %v1578_v1 }
  0xb8   :  { %v1628_v4 = vpop.trf.xlu0 }
  0xb9   :  { %239 = vperm.xlu2 %1407, %v1628_v4   ;;  %149 = vperm.xlu1 %1406, %v1628_v4  }
  0xc0   :  { %v1632_v5 = vpop.trf.xlu0 }
  0xc8   :  { %v1634_v6 = vpop.trf.xlu0 }
  0xd0   :  { %v1636_v7 = vpop.trf.xlu0 }
  0xd8   :  { %v1638_v8 = vpop.trf.xlu0 }
  0xe0   :  { %v1640_v9 = vpop.trf.xlu0 }
  0xe8   :  { %v1642_v10 = vpop.trf.xlu0 }
  0xe9   :  { %263 = vperm.xlu2 %1407, %v1642_v10   ;;  %179 = vperm.xlu1 %1406, %v1642_v10  }
  0xf0   :  { %v1646_v11 = vpop.trf.xlu0 }
  0xf1   :  { %1408 = vset.pattern.permute.xlu2 %v2538_v2  ;;  %154 = vperm.xlu1 %1406, %v1632_v5  }
  0xf2   :  { %267 = vperm.xlu0 %1410, %v1646_v11   ;;  %184 = vperm.xlu2 %1408, %v1646_v11  }
  0xf8   :  { %v1662_v13 = vpop.trf.xlu0 }
  0xf9   :  { %1409 = vset.pattern.permute.xlu1 %v1578_v1 }
  0xfa   :  { %243 = vperm.xlu1 %1409, %v1632_v5   ;;  %1412 = vset.pattern.permute.xlu2 %v1580_v12 }
  0xfb   :  { %345 = vperm.xlu2 %1412, %v1632_v5   ;;  %1442 = vset.pattern.permute.xlu0 %v1581_v20 }
 0x100   :  { %v1675_v16 = vpop.trf.xlu0 }
 0x102   :  { %1411 = vset.pattern.permute.xlu1 %v1580_v12 }
 0x103   :  { %341 = vperm.xlu1 %1411, %v1628_v4   ;;  %369 = vperm.xlu2 %1412, %v1646_v11  }
 0x108   :  { %v1703_v33 = vpop.trf.xlu0 }
 0x10b   :  { %365 = vperm.xlu1 %1411, %v1642_v10   ;;  %1413 = vset.pattern.permute.xlu2 %v2538_v2 }
 0x10c   :  { %159 = vperm.xlu2 %1413, %v1634_v6  }
 0x110   :  { %v1721_v37 = vpop.trf.xlu0 }
 0x113   :  { %1414 = vset.pattern.permute.xlu1 %v2538_v2  ;;  %v240_v25 = vpop.permute.xlu2 %239 }
 0x114   :  { %1416 = vset.pattern.permute.xlu2 %v1578_v1  ;;  %189 = vperm.xlu1 %1414, %v1662_v13   ;;  %v292_v27 = vmul.f32 %v1683_v21, %v240_v25  ;;  %v293_v28 = vmul.f32 %v1685_v22, %v240_v25 }
 0x115   :  { %271 = vperm.xlu2 %1416, %v1662_v13  }
 0x11c   :  { %1415 = vset.pattern.permute.xlu1 %v1578_v1 }
 0x11d   :  { %1417 = vset.pattern.permute.xlu2 %v2538_v2  ;;  %247 = vperm.xlu1 %1415, %v1634_v6  }
 0x11e   :  { %164 = vperm.xlu2 %1417, %v1636_v7  }
 0x125   :  { %251 = vperm.xlu1 %1415, %v1636_v7  }
 0x126   :  { %194 = vperm.xlu2 %1417, %v1675_v16  }
 0x12b   :  { %v150_v26 = vpop.permute.xlu1 %149 }
 0x12c   :  { %v214_v29 = vmul.f32 %v1687_v23, %v150_v26  ;;  %v215_v30 = vmul.f32 %v1689_v24, %v150_v26 }
 0x12d   :  { %1419 = vset.pattern.permute.xlu1 %v2538_v2 }
 0x12e   :  { %v1696_v31 = vadd.f32 %v292_v27, %v214_v29  ;;  %v1698_v32 = vadd.f32 %v293_v28, %v215_v30  ;;  %169 = vperm.xlu1 %1419, %v1638_v8   ;;  %1418 = vset.pattern.permute.xlu2 %v1578_v1 }
 0x12f   :  { %275 = vperm.xlu2 %1418, %v1675_v16  }
 0x136   :  { %199 = vperm.xlu1 %1419, %v1703_v33  }
 0x137   :  { %1421 = vset.pattern.permute.xlu2 %v1580_v12 }
 0x138   :  { %373 = vperm.xlu2 %1421, %v1662_v13  }
 0x13e   :  { %1420 = vset.pattern.permute.xlu1 %v1580_v12 }
 0x13f   :  { %349 = vperm.xlu1 %1420, %v1634_v6  }
 0x140   :  { %1423 = vset.pattern.permute.xlu2 %v2538_v2 }
 0x141   :  { %174 = vperm.xlu2 %1423, %v1640_v9  }
 0x143   :  { %v264_v34 = vpop.permute.xlu2 %263 }
 0x144   :  { %v304_v39 = vmul.f32 %v1683_v21, %v264_v34  ;;  %v305_v40 = vmul.f32 %v1685_v22, %v264_v34 }
 0x147   :  { %1422 = vset.pattern.permute.xlu1 %v1581_v20 }
 0x148   :  { %443 = vperm.xlu1 %1422, %v1628_v4  }
 0x149   :  { %1424 = vset.pattern.permute.xlu2 %v1581_v20 }
 0x14a   :  { %447 = vperm.xlu2 %1424, %v1632_v5  }
 0x14c   :  { %v185_v35 = vpop.permute.xlu2 %184 }
 0x14d   :  { %v228_v48 = vmul.f32 %v1687_v23, %v185_v35  ;;  %v229_v49 = vmul.f32 %v1689_v24, %v185_v35 }
 0x150   :  { %467 = vperm.xlu1 %1422, %v1642_v10  }
 0x152   :  { %471 = vperm.xlu2 %1424, %v1646_v11  }
 0x155   :  { %v346_v36 = vpop.permute.xlu2 %345 }
 0x156   :  { %v396_v10 = vmul.f32 %v1734_v50, %v346_v36  ;;  %v397_v11 = vmul.f32 %v1736_v51, %v346_v36 }
 0x158   :  { %1425 = vset.pattern.permute.xlu1 %v1578_v1 }
 0x159   :  { %255 = vperm.xlu1 %1425, %v1638_v8  }
 0x15a   :  { %1426 = vset.pattern.permute.xlu2 %v1578_v1 }
 0x15b   :  { %v180_v38 = vpop.permute.xlu1 %179  ;;  %279 = vperm.xlu2 %1426, %v1703_v33  }
 0x15c   :  { %v226_v41 = vmul.f32 %v1687_v23, %v180_v38  ;;  %v227_v42 = vmul.f32 %v1689_v24, %v180_v38 }
 0x15d   :  { %v370_v43 = vpop.permute.xlu2 %369 }
 0x15e   :  { %v328_v44 = vadd.f32 %v304_v39, %v226_v41  ;;  %v329_v45 = vadd.f32 %v305_v40, %v227_v42  ;;  %v408_v54 = vmul.f32 %v1734_v50, %v370_v43  ;;  %v409_v55 = vmul.f32 %v1736_v51, %v370_v43 }
 0x161   :  { %1427 = vset.pattern.permute.xlu1 %v1580_v12 }
 0x162   :  { %353 = vperm.xlu1 %1427, %v1636_v7  }
 0x163   :  { %v155_v52 = vpop.permute.xlu1 %154  ;;  %1428 = vset.pattern.permute.xlu2 %v1580_v12 }
 0x164   :  { %377 = vperm.xlu2 %1428, %v1675_v16   ;;  %v268_v53 = vpop.permute.xlu0 %267  ;;  %v216_v0 = vmul.f32 %v1687_v23, %v155_v52  ;;  %v217_v3 = vmul.f32 %v1689_v24, %v155_v52 }
 0x165   :  { %v306_v56 = vmul.f32 %v1683_v21, %v268_v53  ;;  %v307_v57 = vmul.f32 %v1685_v22, %v268_v53  ;;  %v816_v53 = vlaneseq }
 0x166   :  { %v1744_v58 = vpop.permute.xlu2 %159 }
 0x167   :  { %v330_v59 = vadd.f32 %v306_v56, %v228_v48  ;;  %v331_v60 = vadd.f32 %v307_v57, %v229_v49  ;;  %v219_v56 = vmul.f32 %v1689_v24, %v1744_v58 }
 0x169   :  { %v1746_v61 = vadd.f32 %v408_v54, %v330_v59  ;;  %v1748_v62 = vadd.f32 %v409_v55, %v331_v60  ;;  %v1804_v55 = vshrl.u32 %v816_v53, 7 }
 0x16a   :  { %1429 = vset.pattern.permute.xlu1 %v1581_v20 }
 0x16b   :  { %451 = vperm.xlu1 %1429, %v1634_v6   ;;  %v826_v60 = vand.u32 65535, %v1804_v55 }
 0x16c   :  { %v244_v63 = vpop.permute.xlu1 %243  ;;  %1430 = vset.pattern.permute.xlu2 %v1581_v20 }
 0x16d   :  { %v294_v4 = vmul.f32 %v1683_v21, %v244_v63  ;;  %v295_v5 = vmul.f32 %v1685_v22, %v244_v63  ;;  %475 = vperm.xlu2 %1430, %v1662_v13  }
 0x16f   :  { %v318_v15 = vadd.f32 %v294_v4, %v216_v0  ;;  %v319_v17 = vadd.f32 %v295_v5, %v217_v3  ;;  %v272_v6 = vpop.permute.xlu2 %271  ;;  %v830_v5 = vmul.u32 43690, %v826_v60 }
 0x170   :  { %v309_v39 = vmul.f32 %v1685_v22, %v272_v6 }
 0x171   :  { %v1760_v18 = vadd.f32 %v396_v10, %v318_v15  ;;  %v1762_v19 = vadd.f32 %v397_v11, %v319_v17  ;;  %v829_v17 = vmul.u32 43691, %v826_v60 }
 0x173   :  { %1431 = vset.pattern.permute.xlu1 %v2538_v2 }
 0x174   :  { %204 = vperm.xlu1 %1431, %v1721_v37  }
 0x175   :  { %v342_v25 = vpop.permute.xlu1 %341  ;;  %1432 = vset.pattern.permute.xlu2 %v1578_v1 }
 0x176   :  { %v394_v13 = vmul.f32 %v1734_v50, %v342_v25  ;;  %v395_v26 = vmul.f32 %v1736_v51, %v342_v25  ;;  %259 = vperm.xlu2 %1432, %v1640_v9  }
 0x178   :  { %v1771_v27 = vadd.f32 %v394_v13, %v1696_v31  ;;  %v1774_v28 = vadd.f32 %v395_v26, %v1698_v32  ;;  %v165_v29 = vpop.permute.xlu2 %164 }
 0x179   :  { %v220_v25 = vmul.f32 %v1687_v23, %v165_v29  ;;  %v221_v13 = vmul.f32 %v1689_v24, %v165_v29 }
 0x17c   :  { %1433 = vset.pattern.permute.xlu1 %v1578_v1  ;;  %v308_v1 = vmul.f32 %v1683_v21, %v272_v6  ;;  %v833_v6 = vshll.u32 %v830_v5, 16 }
 0x17d   :  { %v366_v30 = vpop.permute.xlu1 %365  ;;  %283 = vperm.xlu1 %1433, %v1721_v37  }
 0x17e   :  { %v406_v34 = vmul.f32 %v1734_v50, %v366_v30  ;;  %v407_v35 = vmul.f32 %v1736_v51, %v366_v30  ;;  %1434 = vset.pattern.permute.xlu2 %v1580_v12  ;;  %vm837_vm0 = vc.u32 %v829_v17, %v833_v6  ;;  %v839_v29 = vadd.s32 %v833_v6, %v829_v17 }
 0x17f   :  { %357 = vperm.xlu2 %1434, %v1638_v8  }
 0x180   :  { %v1782_v36 = vadd.f32 %v406_v34, %v328_v44  ;;  %v1784_v31 = vadd.f32 %v407_v35, %v329_v45  ;;  %v195_v32 = vpop.permute.xlu2 %194 }
 0x181   :  { %v232_v42 = vmul.f32 %v1687_v23, %v195_v32  ;;  %v233_v43 = vmul.f32 %v1689_v24, %v195_v32 }
 0x185   :  { %1435 = vset.pattern.permute.xlu1 %v1580_v12 }
 0x186   :  { %v190_v38 = vpop.permute.xlu1 %189  ;;  %381 = vperm.xlu1 %1435, %v1703_v33  }
 0x187   :  { %v230_v40 = vmul.f32 %v1687_v23, %v190_v38  ;;  %v231_v41 = vmul.f32 %v1689_v24, %v190_v38  ;;  %1436 = vset.pattern.permute.xlu2 %v1581_v20 }
 0x188   :  { %455 = vperm.xlu2 %1436, %v1636_v7   ;;  %v218_v7 = vmul.f32 %v1687_v23, %v1744_v58  ;;  %v827_v58 = vshrl.u32 %v1804_v55, 16 }
 0x189   :  { %v332_v44 = vadd.f32 %v308_v1, %v230_v40  ;;  %v333_v45 = vadd.f32 %v309_v39, %v231_v41  ;;  %v276_v46 = vpop.permute.xlu2 %275  ;;  %v1842_v40 = vadd.s32 8, %v1804_v55 }
 0x18a   :  { %v310_v47 = vmul.f32 %v1683_v21, %v276_v46  ;;  %v311_v48 = vmul.f32 %v1685_v22, %v276_v46  ;;  %v831_v15 = vmul.u32 43691, %v827_v58  ;;  %v832_v35 = vmul.u32 43690, %v827_v58 }
 0x18c   :  { %v1798_v49 = vadd.f32 %v310_v47, %v232_v42  ;;  %v1800_v52 = vadd.f32 %v311_v48, %v233_v43  ;;  %v835_v32 = vshll.u32 %v831_v15, 16  ;;  %v490_v42 = vperm.slane %v1672_v14, 3 }
 0x18d   :  { %v491_v43 = vperm.slane %v1672_v14, 7  ;;  %v834_v48 = vshrl.u32 %v830_v5, 16 }
 0x18e   :  { %2555 = vst [vmem:[#allocation17_spill] sm:$0xff] %v1798_v49  ;;  %1437 = vset.pattern.permute.xlu1 %v1581_v20  ;;  %vm841_vm1 = vc.u32 %v839_v29, %v835_v32 }
 0x18f   :  { %2556 = vst [vmem:[#allocation18_spill] sm:$0xff] %v1800_v52  ;;  %v248_v54 = vpop.permute.xlu1 %247  ;;  %479 = vperm.xlu1 %1437, %v1675_v16  }
 0x190   :  { %v296_v57 = vmul.f32 %v1683_v21, %v248_v54  ;;  %v297_v59 = vmul.f32 %v1685_v22, %v248_v54  ;;  %1438 = vset.pattern.permute.xlu2 %v1580_v12  ;;  %v1853_v54 = vperm.slane %v490_v42, 3 }
 0x191   :  { %361 = vperm.xlu2 %1438, %v1640_v9  }
 0x192   :  { %v1815_v63 = vadd.f32 %v296_v57, %v218_v7  ;;  %v1817_v16 = vadd.f32 %v297_v59, %v219_v56  ;;  %v374_v0 = vpop.permute.xlu2 %373  ;;  %v1855_v7 = vperm.slane %v491_v43, 3  ;;  %v836_v59 = vshrl.u32 %v831_v15, 16 }
 0x193   :  { %v410_v3 = vmul.f32 %v1734_v50, %v374_v0  ;;  %v411_v4 = vmul.f32 %v1736_v51, %v374_v0 }
 0x195   :  { %v1822_v10 = vadd.f32 %v410_v3, %v332_v44  ;;  %v1824_v11 = vadd.f32 %v411_v4, %v333_v45  ;;  %v842_v44 = vsel %vm841_vm1, 1, %v2538_v2  ;;  %v855_v45 = vand.u32 65535, %v1842_v40 }
 0x197   :  { %v252_v26 = vpop.permute.xlu1 %251  ;;  %1439 = vset.pattern.permute.xlu1 %v1580_v12  ;;  %v838_v12 = vsel %vm837_vm0, 1, %v2538_v2  ;;  %v859_v46 = vmul.u32 43690, %v855_v45  ;;  %v858_v14 = vmul.u32 43691, %v855_v45 }
 0x198   :  { %v298_v30 = vmul.f32 %v1683_v21, %v252_v26  ;;  %v299_v34 = vmul.f32 %v1685_v22, %v252_v26  ;;  %385 = vperm.xlu1 %1439, %v1721_v37   ;;  %v840_v41 = vadd.s32 %v838_v12, %v832_v35 }
 0x199   :  { %1440 = vset.pattern.permute.xlu2 %v1581_v20  ;;  %v862_v57 = vshll.u32 %v859_v46, 16 }
 0x19a   :  { %v1833_v38 = vadd.f32 %v298_v30, %v220_v25  ;;  %v1835_v1 = vadd.f32 %v299_v34, %v221_v13  ;;  %459 = vperm.xlu2 %1440, %v1638_v8   ;;  %v856_v8 = vshrl.u32 %v1842_v40, 16  ;;  %v844_v53 = vadd.s32 %v842_v44, %v840_v41 }
 0x19b   :  { %v1838_v39 = vpop.permute.xlu2 %174  ;;  %vm866_vm2 = vc.u32 %v858_v14, %v862_v57  ;;  %v863_v34 = vshrl.u32 %v859_v46, 16 }
 0x19c   :  { %v860_v56 = vmul.u32 43691, %v856_v8  ;;  %v845_v3 = vadd.s32 %v844_v53, %v834_v48  ;;  %v861_v4 = vmul.u32 43690, %v856_v8  ;;  %v867_v5 = vsel %vm866_vm2, 1, %v2538_v2  ;;  %v762_v48 = vld [vmem:[#allocation7] sm:$0x3] }
 0x19d   :  { %v1893_v53 = vadd.s32 16, %v1804_v55 }
 0x19e   :  { %v864_v60 = vshll.u32 %v860_v56, 16  ;;  %v846_v6 = vadd.s32 %v845_v3, %v836_v59  ;;  %v869_v25 = vadd.s32 %v867_v5, %v861_v4  ;;  %v865_v41 = vshrl.u32 %v860_v56, 16 }
 0x19f   :  { %v1902_v56 = vperm.slane %v762_v48, 0 }
 0x1a0   :  { %v1849_v47 = vpop.permute.xlu1 %169  ;;  %1441 = vset.pattern.permute.xlu1 %v1581_v20  ;;  %v868_v20 = vadd.s32 %v862_v57, %v858_v14  ;;  %v847_v30 = vshrl.u32 %v846_v6, 1  ;;  %v1904_v57 = vperm.slane %v762_v48, 1 }
 0x1a1   :  { %483 = vperm.xlu1 %1441, %v1703_v33   ;;  %v1915_v3 = vmul.f32 %v1687_v23, %v1849_v47 }
 0x1a2   :  { %463 = vperm.xlu2 %1440, %v1640_v9   ;;  %vm870_vm3 = vc.u32 %v868_v20, %v864_v60  ;;  %v848_v12 = vmul.u32 3, %v847_v30 }
 0x1a3   :  { %v871_v13 = vsel %vm870_vm3, 1, %v2538_v2 }
 0x1a4   :  { %v448_v0 = vpop.permute.xlu2 %447  ;;  %v873_v35 = vadd.s32 %v871_v13, %v869_v25 }
 0x1a5   :  { %v498_v58 = vmul.f32 %v1853_v54, %v448_v0  ;;  %v499_v33 = vmul.f32 %v1855_v7, %v448_v0  ;;  %v1911_v0 = vmul.f32 %v1689_v24, %v1838_v39 }
 0x1a6   :  { %v874_v42 = vadd.s32 %v873_v35, %v863_v34 }
 0x1a7   :  { %v1862_v17 = vadd.f32 %v498_v58, %v1760_v18  ;;  %v1865_v9 = vadd.f32 %v499_v33, %v1762_v19  ;;  %2558 = vst [vmem:[#allocation20_spill] sm:$0xff] %v1911_v0  ;;  %v1925_v33 = vmul.f32 %v1689_v24, %v1849_v47  ;;  %v2565_v0 = vmov 0  }
 0x1a8   :  { %v1867_v15 = vpop.permute.xlu1 %199  ;;  %v875_v46 = vadd.s32 %v874_v42, %v865_v41 }
 0x1a9   :  { %487 = vperm.xlu1 %1441, %v1721_v37   ;;  %v2536_v25 = vrot.slane %v1862_v17, 7  ;;  %v2537_v13 = vrot.slane %v1865_v9, 7  ;;  %v2540_v34 = vrot.slane %v1862_v17, 1  ;;  %v2541_v35 = vrot.slane %v1865_v9, 1 }
 0x1aa   :  { %v876_v14 = vshrl.u32 %v875_v46, 1 }
 0x1ac   :  { %v472_v26 = vpop.permute.xlu2 %471  ;;  %v877_v5 = vmul.u32 3, %v876_v14 }
 0x1ad   :  { %v510_v32 = vmul.f32 %v1853_v54, %v472_v26  ;;  %v511_v18 = vmul.f32 %v1855_v7, %v472_v26 }
 0x1af   :  { %v1874_v29 = vadd.f32 %v510_v32, %v1746_v61  ;;  %v1877_v19 = vadd.f32 %v511_v18, %v1748_v62  ;;  %v1888_v61 = vsub.s32 %v1804_v55, %v848_v12 }
 0x1b1   :  { %v350_v37 = vpop.permute.xlu1 %349  ;;  %vm997_vm4 = vcmp.ne.s32.totalorder %v1888_v61, 0  ;;  %vm1003_vm5 = vcmp.lt.s32.totalorder %v1888_v61, 0  ;;  %v1907_v59 = vadd.s32 3, %v1888_v61  ;;  %v2542_v47 = vrot.slane %v1874_v29, 7 }
 0x1b2   :  { %v398_v43 = vmul.f32 %v1734_v50, %v350_v37  ;;  %v399_v44 = vmul.f32 %v1736_v51, %v350_v37  ;;  %vm1917_vm8 = vmand %vm1003_vm5, %vm997_vm4 }
 0x1b4   :  { %v1882_v45 = vadd.f32 %v398_v43, %v1815_v63  ;;  %v1885_v8 = vadd.f32 %v399_v44, %v1817_v16  ;;  %v884_v63 = vand.u32 65535, %v1893_v53  ;;  %v1900_v16 = vmul.f32 %v1687_v23, %v1838_v39 }
 0x1b5   :  { %v1890_v62 = vpop.permute.xlu2 %279  ;;  %v885_v39 = vshrl.u32 %v1893_v53, 16 }
 0x1b6   :  { %2557 = vst [vmem:[#allocation19_spill] sm:$0xff] %v1900_v16  ;;  %v1928_v6 = vmul.u32 43690, %v884_v63 }
 0x1b7   :  { %v1946_v43 = vmul.u32 43691, %v885_v39 }
 0x1b8   :  { %v891_v44 = vshll.u32 %v1928_v6, 16 }
 0x1ba   :  { %v444_v60 = vpop.permute.xlu1 %443 }
 0x1bb   :  { %v496_v20 = vmul.f32 %v1853_v54, %v444_v60  ;;  %v497_v58 = vmul.f32 %v1855_v7, %v444_v60 }
 0x1bd   :  { %v520_v26 = vadd.f32 %v496_v20, %v1771_v27  ;;  %v521_v30 = vadd.f32 %v497_v58, %v1774_v28  ;;  %v1944_v27 = vsub.s32 %v1842_v40, %v877_v5  ;;  %v887_v28 = vmul.u32 43691, %v884_v63 }
 0x1be   :  { %v1941_v18 = vpop.permute.xlu2 %377 }
 0x1bf   :  { %2561 = vst [vmem:[#allocation21_spill] sm:$0xff] %v1941_v18  ;;  %v569_v12 = vrot.slane %v520_v26, 7  ;;  %v570_v41 = vrot.slane %v521_v30, 7  ;;  %v642_v42 = vrot.slane %v520_v26, 1  ;;  %v645_v37 = vrot.slane %v521_v30, 1 }
 0x1c0   :  { %vm998_vm9 = vcmp.ne.s32.totalorder %v1944_v27, 0  ;;  %vm1004_vm10 = vcmp.lt.s32.totalorder %v1944_v27, 0  ;;  %vm1981_vm11 = vc.u32 %v887_v28, %v891_v44 }
 0x1c1   :  { %v1952_v46 = vsel %vm568_vm6, %v569_v12, %v2536_v25  ;;  %v1957_v48 = vsel %vm568_vm6, %v570_v41, %v2537_v13  ;;  %v637_v14 = vsel %vm568_vm6, %v520_v26, %v569_v12  ;;  %v638_v40 = vsel %vm568_vm6, %v521_v30, %v570_v41  ;;  %vm2019_vm13 = vmand %vm1004_vm10, %vm998_vm9 }
 0x1c2   :  { %2562 = vst [vmem:[#allocation22_spill] sm:$0xff] %v1957_v48  ;;  %v644_v63 = vsel %vm641_vm7, %v642_v42, %v2540_v34  ;;  %v647_v60 = vsel %vm641_vm7, %v645_v37, %v2541_v35  ;;  %v714_v20 = vmax.f32 %v637_v14, %v520_v26  ;;  %v715_v58 = vmax.f32 %v638_v40, %v521_v30  ;;  %v468_v5 = vpop.permute.xlu1 %467 }
 0x1c3   :  { %v595_v25 = vrot.slane %v1877_v19, 7  ;;  %v665_v13 = vrot.slane %v1874_v29, 1  ;;  %v508_v32 = vmul.f32 %v1853_v54, %v468_v5  ;;  %v509_v12 = vmul.f32 %v1855_v7, %v468_v5 }
 0x1c4   :  { %v738_v41 = vmax.f32 %v714_v20, %v644_v63  ;;  %v739_v2 = vmax.f32 %v715_v58, %v647_v60  ;;  %v668_v26 = vrot.slane %v1877_v19, 1  ;;  %v893_v14 = vshll.u32 %v1946_v43, 16 }
 0x1c5   :  { %v532_v30 = vadd.f32 %v508_v32, %v1782_v36  ;;  %v533_v37 = vadd.f32 %v509_v12, %v1784_v31  ;;  %v897_v63 = vadd.s32 %v891_v44, %v887_v28  ;;  %v1016_v36 = vadd.s32 3, %v1944_v27 }
 0x1c6   :  { %v890_v12 = vmul.u32 43690, %v885_v39  ;;  %v896_v16 = vsel %vm1981_vm11, 1, %v2565_v0 }
 0x1c7   :  { %v591_v60 = vrot.slane %v532_v30, 7  ;;  %v592_v20 = vrot.slane %v533_v37, 7  ;;  %v664_v58 = vrot.slane %v532_v30, 1  ;;  %v667_v5 = vrot.slane %v533_v37, 1  ;;  %v476_v34 = vpop.permute.xlu2 %475 }
 0x1c8   :  { %v512_v31 = vmul.f32 %v1853_v54, %v476_v34  ;;  %v513_v32 = vmul.f32 %v1855_v7, %v476_v34  ;;  %vm1999_vm12 = vc.u32 %v897_v63, %v893_v14 }
 0x1c9   :  { %v594_v42 = vsel %vm568_vm6, %v591_v60, %v2542_v47  ;;  %v596_v35 = vsel %vm568_vm6, %v592_v20, %v595_v25  ;;  %v639_v28 = vsel %vm568_vm6, %v532_v30, %v591_v60  ;;  %v640_v44 = vsel %vm568_vm6, %v533_v37, %v592_v20 }
 0x1ca   :  { %v666_v52 = vsel %vm641_vm7, %v664_v58, %v665_v13  ;;  %v669_v49 = vsel %vm641_vm7, %v667_v5, %v668_v26  ;;  %v726_v34 = vmax.f32 %v639_v28, %v532_v30  ;;  %v727_v47 = vmax.f32 %v640_v44, %v533_v37 }
 0x1cb   :  { %v2004_v18 = vadd.f32 %v512_v31, %v1822_v10  ;;  %v2007_v60 = vadd.f32 %v513_v32, %v1824_v11  ;;  %v256_v20 = vpop.permute.xlu1 %255  ;;  %v728_v58 = vmax.f32 %v594_v42, %v1874_v29  ;;  %v729_v5 = vmax.f32 %v596_v35, %v1877_v19 }
 0x1cc   :  { %v300_v40 = vmul.f32 %v1683_v21, %v256_v20  ;;  %v301_v14 = vmul.f32 %v1685_v22, %v256_v20  ;;  %v750_v63 = vmax.f32 %v726_v34, %v666_v52  ;;  %v751_v48 = vmax.f32 %v727_v47, %v669_v49 }
 0x1cd   :  { %v2548_v30 = vrot.slane %v2004_v18, 7  ;;  %v2547_v37 = vrot.slane %v2007_v60, 7  ;;  %v2546_v11 = vrot.slane %v2004_v18, 1  ;;  %v2545_v19 = vrot.slane %v2007_v60, 1 }
 0x1ce   :  { %v2026_v35 = vadd.f32 %v300_v40, %v1915_v3  ;;  %v2029_v49 = vadd.f32 %v301_v14, %v1925_v33  ;;  %v780_v52 = vadd.f32 %v1902_v56, %v750_v63  ;;  %v781_v47 = vadd.f32 %v1904_v57, %v751_v48 }
 0x1cf   :  { %v2570_v42 = vrot.slane %v1874_v29, 7  ;;  %v2043_v32 = vsel %vm568_vm6, %v595_v25, %v2547_v37  ;;  %v671_v3 = vsel %vm641_vm7, %v665_v13, %v2546_v11  ;;  %v673_v33 = vsel %vm641_vm7, %v668_v26, %v2545_v19 }
 0x1d0   :  { %v2055_v28 = vpop.permute.xlu2 %259  ;;  %v768_v44 = vadd.f32 %v1902_v56, %v738_v41  ;;  %v1022_v25 = vsel %vm2019_vm13, %v1016_v36, %v1944_v27  ;;  %v752_v34 = vmax.f32 %v728_v58, %v671_v3  ;;  %v753_v13 = vmax.f32 %v729_v5, %v673_v33 }
 0x1d1   :  { %v2038_v31 = vsel %vm568_vm6, %v2570_v42, %v2548_v30  ;;  %v769_v20 = vadd.f32 %v1904_v57, %v739_v2  ;;  %v892_v26 = vshrl.u32 %v1928_v6, 16  ;;  %v898_v40 = vadd.s32 %v896_v16, %v890_v12 }
 0x1d2   :  { %v900_v14 = vsel %vm1999_vm12, 1, %v2565_v0  ;;  %v804_v63 = vmax.f32 %v780_v52, 0.0  ;;  %v805_v42 = vmax.f32 %v781_v47, 0.0  ;;  %v782_v29 = vadd.f32 %v1902_v56, %v752_v34 }
 0x1d3   :  { %v783_v41 = vadd.f32 %v1904_v57, %v753_v13  ;;  %vm2068_vm14 = vcmp.eq.s32.totalorder %v1022_v25, 0  ;;  %v894_v2 = vshrl.u32 %v1946_v43, 16  ;;  %v902_v36 = vadd.s32 %v900_v14, %v898_v40 }
 0x1d4   :  { %v354_v27 = vpop.permute.xlu1 %353  ;;  %v2074_v16 = vadd.s32 24, %v1804_v55  ;;  %v2573_v6 = vsel %vm1917_vm8, %v1907_v59, %v1888_v61  ;;  %v792_v39 = vmax.f32 %v768_v44, 0.0  ;;  %v806_v58 = vmax.f32 %v782_v29, 0.0 }
 0x1d5   :  { %vm2081_vm15 = vcmp.eq.s32.totalorder %v2573_v6, 0  ;;  %v807_v5 = vmax.f32 %v783_v41, 0.0  ;;  %v793_v52 = vmax.f32 %v769_v20, 0.0  ;;  %v903_v47 = vadd.s32 %v902_v36, %v892_v26 }
 0x1d6   :  { %v913_v43 = vand.u32 65535, %v2074_v16  ;;  %v914_v3 = vshrl.u32 %v2074_v16, 16  ;;  %v1057_v33 = vsel %vm2081_vm15, %v804_v63, 0.0  ;;  %v1058_v4 = vsel %vm2081_vm15, %v805_v42, 0.0 }
 0x1d7   :  { %v1059_v61 = vsel %vm2068_vm14, %v806_v58, 0.0  ;;  %v1060_v59 = vsel %vm2068_vm14, %v807_v5, 0.0  ;;  %v400_v25 = vmul.f32 %v1734_v50, %v354_v27  ;;  %v904_v34 = vadd.s32 %v903_v47, %v894_v2 }
 0x1d8   :  { %v2095_v29 = vadd.f32 %v1059_v61, %v1057_v33  ;;  %v2097_v44 = vadd.f32 %v1060_v59, %v1058_v4  ;;  %v916_v20 = vmul.u32 43691, %v913_v43  ;;  %v917_v26 = vmul.u32 43690, %v913_v43 }
 0x1d9   :  { %v2100_v13 = vpop.permute.xlu2 %357  ;;  %v2102_v40 = vmul.u32 43691, %v914_v3  ;;  %v2105_v14 = vadd.s32 32, %v1804_v55  ;;  %v2109_v63 = vmul.f32 %v1687_v23, %v1867_v15  ;;  %v2113_v42 = vmul.f32 %v1689_v24, %v1867_v15 }
 0x1da   :  { %2576 = vst [vmem:[#allocation23_spill] sm:$0xff] %v2097_v44  ;;  %v2117_v41 = vmul.f32 %v1683_v21, %v1890_v62  ;;  %v905_v2 = vshrl.u32 %v904_v34, 1  ;;  %v401_v36 = vmul.f32 %v1736_v51, %v354_v27  ;;  %v919_v6 = vmul.u32 43690, %v914_v3 }
 0x1db   :  { %v920_v58 = vshll.u32 %v917_v26, 16  ;;  %v922_v5 = vshll.u32 %v2102_v40, 16  ;;  %v2123_v47 = vmul.f32 %v1685_v22, %v1890_v62  ;;  %v2127_v43 = vsel %vm2081_vm15, %v792_v39, 0.0 }
 0x1dc   :  { %v2131_v15 = vsel %vm2081_vm15, %v793_v52, 0.0  ;;  %v906_v33 = vmul.u32 3, %v905_v2  ;;  %v424_v4 = vadd.f32 %v400_v25, %v1833_v38  ;;  %v942_v61 = vand.u32 65535, %v2105_v14 }
 0x1dd   :  { %v452_v27 = vpop.permute.xlu1 %451  ;;  %vm924_vm0 = vc.u32 %v916_v20, %v920_v58  ;;  %v926_v3 = vadd.s32 %v920_v58, %v916_v20  ;;  %v425_v12 = vadd.f32 %v401_v36, %v1835_v1  ;;  %v921_v52 = vshrl.u32 %v917_v26, 16 }
 0x1de   :  { %v500_v59 = vmul.f32 %v1853_v54, %v452_v27  ;;  %v501_v62 = vmul.f32 %v1855_v7, %v452_v27  ;;  %v2138_v34 = vsub.s32 %v1893_v53, %v906_v33  ;;  %v925_v39 = vsel %vm924_vm0, 1, %v2565_v0 }
 0x1df   :  { %v927_v2 = vadd.s32 %v925_v39, %v919_v6  ;;  %vm928_vm1 = vc.u32 %v926_v3, %v922_v5  ;;  %v923_v20 = vshrl.u32 %v2102_v40, 16  ;;  %v943_v58 = vshrl.u32 %v2105_v14, 16 }
 0x1e0   :  { %v524_v38 = vadd.f32 %v500_v59, %v1882_v45  ;;  %v525_v25 = vadd.f32 %v501_v62, %v1885_v8  ;;  %vm999_vm2 = vcmp.ne.s32.totalorder %v2138_v34, 0  ;;  %vm1005_vm3 = vcmp.lt.s32.totalorder %v2138_v34, 0 }
 0x1e1   :  { %v929_v53 = vsel %vm928_vm1, 1, %v2565_v0  ;;  %v2149_v33 = vmul.u32 43690, %v942_v61  ;;  %v1017_v45 = vadd.s32 3, %v2138_v34  ;;  %v2577_v3 = vrot.slane %v1862_v17, 7  ;;  %vm2176_vm4 = vmand %vm1005_vm3, %vm999_vm2 }
 0x1e2   :  { %v575_v1 = vrot.slane %v524_v38, 7  ;;  %v577_v26 = vrot.slane %v525_v25, 7  ;;  %v648_v36 = vrot.slane %v524_v38, 1  ;;  %v650_v6 = vrot.slane %v525_v25, 1  ;;  %v456_v5 = vpop.permute.xlu2 %455 }
 0x1e3   :  { %v502_v8 = vmul.f32 %v1853_v54, %v456_v5  ;;  %v503_v40 = vmul.f32 %v1855_v7, %v456_v5  ;;  %v931_v27 = vadd.s32 %v929_v53, %v927_v2  ;;  %v2578_v62 = vrot.slane %v1865_v9, 7  ;;  %v2582_v5 = vld [vmem:[#allocation22_spill] sm:$0xff] }
 0x1e4   :  { %v576_v59 = vsel %vm568_vm6, %v2577_v3, %v575_v1  ;;  %v2579_v48 = vrot.slane %v1862_v17, 1  ;;  %v2580_v11 = vrot.slane %v1865_v9, 1  ;;  %v2581_v2 = vmax.f32 %v1952_v46, %v1862_v17 }
 0x1e5   :  { %v578_v39 = vsel %vm568_vm6, %v2578_v62, %v577_v26  ;;  %v718_v30 = vmax.f32 %v576_v59, %v524_v38  ;;  %v2583_v3 = vmax.f32 %v2582_v5, %v1865_v9  ;;  %v2180_v62 = vadd.f32 %v502_v8, %v424_v4 }
 0x1e6   :  { %v649_v19 = vsel %vm641_vm7, %v2579_v48, %v648_v36  ;;  %v651_v37 = vsel %vm641_vm7, %v2580_v11, %v650_v6  ;;  %v719_v24 = vmax.f32 %v578_v39, %v525_v25  ;;  %v2182_v11 = vadd.f32 %v503_v40, %v425_v12  ;;  %v2184_v38 = vpop.permute.xlu1 %204 }
 0x1e7   :  { %v740_v53 = vmax.f32 %v2581_v2, %v649_v19  ;;  %v741_v23 = vmax.f32 %v2583_v3, %v651_v37  ;;  %2586 = vst [vmem:[#allocation22_spill] sm:$0xff] %v2184_v38  ;;  %v932_v17 = vadd.s32 %v931_v27, %v921_v52  ;;  %v945_v46 = vmul.u32 43691, %v942_v61 }
 0x1e8   :  { %v2188_v37 = vmul.u32 43691, %v943_v58  ;;  %v949_v25 = vshll.u32 %v2149_v33, 16  ;;  %v579_v59 = vrot.slane %v2180_v62, 7  ;;  %v581_v39 = vrot.slane %v2182_v11, 7 }
 0x1e9   :  { %v770_v19 = vadd.f32 %v1902_v56, %v740_v53  ;;  %v771_v9 = vadd.f32 %v1904_v57, %v741_v23  ;;  %v652_v4 = vrot.slane %v2180_v62, 1  ;;  %v654_v12 = vrot.slane %v2182_v11, 1 }
 0x1ea   :  { %v1023_v61 = vsel %vm2176_vm4, %v1017_v45, %v2138_v34  ;;  %v933_v52 = vadd.s32 %v932_v17, %v923_v20  ;;  %v2201_v23 = vsel %vm568_vm6, %v575_v1, %v579_v59  ;;  %v2206_v27 = vsel %vm568_vm6, %v577_v26, %v581_v39 }
 0x1eb   :  { %v794_v8 = vmax.f32 %v770_v19, 0.0  ;;  %v795_v40 = vmax.f32 %v771_v9, 0.0  ;;  %v653_v2 = vsel %vm641_vm7, %v648_v36, %v652_v4  ;;  %v655_v53 = vsel %vm641_vm7, %v650_v6, %v654_v12  ;;  %v362_v45 = vpop.permute.xlu2 %361 }
 0x1ec   :  { %v720_v1 = vmax.f32 %v2201_v23, %v2180_v62  ;;  %v721_v26 = vmax.f32 %v2206_v27, %v2182_v11  ;;  %v742_v3 = vmax.f32 %v718_v30, %v653_v2  ;;  %v743_v48 = vmax.f32 %v719_v24, %v655_v53  ;;  %v2591_v2 = vld [vmem:[#allocation21_spill] sm:$0xff] }
 0x1ed   :  { %v1047_v34 = vsel %vm2068_vm14, %v794_v8, 0.0  ;;  %v1048_v20 = vsel %vm2068_vm14, %v795_v40, 0.0  ;;  %v934_v6 = vshrl.u32 %v933_v52, 1  ;;  %v2225_v17 = vadd.s32 40, %v1804_v55 }
 0x1ee   :  { %v1069_v5 = vadd.f32 %v1047_v34, %v2127_v43  ;;  %v1080_v36 = vadd.f32 %v1048_v20, %v2131_v15  ;;  %v948_v19 = vmul.u32 43690, %v943_v58  ;;  %v951_v10 = vshll.u32 %v2188_v37, 16 }
 0x1ef   :  { %2587 = vst [vmem:[#allocation24_spill] sm:$0xff] %v2225_v17  ;;  %v772_v9 = vadd.f32 %v1902_v56, %v742_v3  ;;  %v773_v8 = vadd.f32 %v1904_v57, %v743_v48  ;;  %vm953_vm5 = vc.u32 %v945_v46, %v949_v25  ;;  %v955_v40 = vadd.s32 %v949_v25, %v945_v46  ;;  %v2240_v55 = vpop.permute.xlu1 %283 }
 0x1f0   :  { %v2232_v43 = vadd.f32 %v2117_v41, %v2109_v63  ;;  %v302_v24 = vmul.f32 %v1683_v21, %v2055_v28  ;;  %vm2236_vm8 = vcmp.eq.s32.totalorder %v1023_v61, 0  ;;  %v954_v15 = vsel %vm953_vm5, 1, %v2565_v0 }
 0x1f1   :  { %v402_v58 = vmul.f32 %v1734_v50, %v2100_v13  ;;  %v796_v52 = vmax.f32 %v772_v9, 0.0  ;;  %v797_v46 = vmax.f32 %v773_v8, 0.0  ;;  %v935_v25 = vmul.u32 3, %v934_v6 }
 0x1f2   :  { %2588 = vst [vmem:[#allocation25_spill] sm:$0xff] %v2232_v43  ;;  %v412_v63 = vmul.f32 %v1734_v50, %v2591_v2  ;;  %v403_v41 = vmul.f32 %v1736_v51, %v2100_v13  ;;  %v956_v61 = vadd.s32 %v954_v15, %v948_v19  ;;  %vm957_vm9 = vc.u32 %v955_v40, %v951_v10  ;;  %v2592_v19 = vld [vmem:[#allocation19_spill] sm:$0xff] }
 0x1f3   :  { %v303_v53 = vmul.f32 %v1685_v22, %v2055_v28  ;;  %v1049_v34 = vsel %vm2236_vm8, %v796_v52, 0.0  ;;  %v1050_v20 = vsel %vm2236_vm8, %v797_v46, 0.0  ;;  %v971_v3 = vand.u32 65535, %v2225_v17 }
 0x1f4   :  { %v413_v48 = vmul.f32 %v1736_v51, %v2591_v2  ;;  %v2258_v6 = vadd.f32 %v1069_v5, %v1049_v34  ;;  %v2260_v9 = vadd.f32 %v1080_v36, %v1050_v20  ;;  %v950_v13 = vshrl.u32 %v2149_v33, 16  ;;  %v460_v40 = vpop.permute.xlu2 %459  ;;  %v2593_v36 = vld [vmem:[#allocation20_spill] sm:$0xff] }
 0x1f5   :  { %v326_v10 = vadd.f32 %v302_v24, %v2592_v19  ;;  %v426_v28 = vadd.f32 %v402_v58, %v2026_v35  ;;  %v936_v8 = vsub.s32 %v2074_v16, %v935_v25  ;;  %v958_v15 = vsel %vm957_vm9, 1, %v2565_v0 }
 0x1f6   :  { %v427_v52 = vadd.f32 %v403_v41, %v2029_v49  ;;  %v504_v46 = vmul.f32 %v1853_v54, %v460_v40  ;;  %v505_v5 = vmul.f32 %v1855_v7, %v460_v40  ;;  %v960_v2 = vadd.s32 %v958_v15, %v956_v61 }
 0x1f7   :  { %v327_v34 = vadd.f32 %v303_v53, %v2593_v36  ;;  %v952_v33 = vshrl.u32 %v2188_v37, 16  ;;  %v972_v24 = vshrl.u32 %v2225_v17, 16  ;;  %v2273_v20 = vmul.u32 43690, %v971_v3 }
 0x1f8   :  { %v404_v35 = vmul.f32 %v1734_v50, %v362_v45  ;;  %v2276_v16 = vadd.f32 %v504_v46, %v426_v28  ;;  %v2278_v58 = vadd.f32 %v505_v5, %v427_v52  ;;  %v961_v49 = vadd.s32 %v960_v2, %v950_v13  ;;  %v382_v61 = vpop.permute.xlu1 %381 }
 0x1f9   :  { %v405_v25 = vmul.f32 %v1736_v51, %v362_v45  ;;  %vm1000_vm10 = vcmp.ne.s32.totalorder %v936_v8, 0  ;;  %vm1006_vm11 = vcmp.lt.s32.totalorder %v936_v8, 0  ;;  %v1018_v41 = vadd.s32 3, %v936_v8  ;;  %v2612_v30 = vld [vmem:[#allocation25_spill] sm:$0xff] }
 0x1fa   :  { %v583_v53 = vrot.slane %v2276_v16, 7  ;;  %v585_v37 = vrot.slane %v2278_v58, 7  ;;  %v656_v19 = vrot.slane %v2276_v16, 1  ;;  %v658_v40 = vrot.slane %v2278_v58, 1  ;;  %vm2288_vm12 = vmand %vm1006_vm11, %vm1000_vm10 }
 0x1fb   :  { %v962_v15 = vadd.s32 %v961_v49, %v952_v33  ;;  %v974_v28 = vmul.u32 43691, %v971_v3  ;;  %v2285_v46 = vmul.u32 43691, %v972_v24  ;;  %v978_v13 = vshll.u32 %v2273_v20, 16 }
 0x1fc   :  { %v584_v52 = vsel %vm568_vm6, %v579_v59, %v583_v53  ;;  %v586_v5 = vsel %vm568_vm6, %v581_v39, %v585_v37  ;;  %v657_v3 = vsel %vm641_vm7, %v652_v4, %v656_v19  ;;  %v659_v2 = vsel %vm641_vm7, %v654_v12, %v658_v40  ;;  %v464_v49 = vpop.permute.xlu2 %463  ;;  %v2596_v12 = vld [vmem:[#allocation17_spill] sm:$0xff] }
 0x1fd   :  { %v722_v36 = vmax.f32 %v584_v52, %v2276_v16  ;;  %v723_v33 = vmax.f32 %v586_v5, %v2278_v58  ;;  %v744_v59 = vmax.f32 %v720_v1, %v657_v3  ;;  %v745_v39 = vmax.f32 %v721_v26, %v659_v2  ;;  %v2597_v16 = vld [vmem:[#allocation18_spill] sm:$0xff] }
 0x1fe   :  { %v428_v17 = vadd.f32 %v404_v35, %v326_v10  ;;  %v429_v38 = vadd.f32 %v405_v25, %v327_v34  ;;  %v506_v4 = vmul.f32 %v1853_v54, %v464_v49  ;;  %v507_v43 = vmul.f32 %v1855_v7, %v464_v49 }
 0x1ff   :  { %v436_v44 = vadd.f32 %v412_v63, %v2596_v12  ;;  %v437_v52 = vadd.f32 %v413_v48, %v2597_v16  ;;  %v1024_v58 = vsel %vm2288_vm12, %v1018_v41, %v936_v8  ;;  %v963_v62 = vshrl.u32 %v962_v15, 1  ;;  %v1393_v16 = vld [vmem:[#allocation8 + $0x78] sm:$0xff] }
 0x200   :  { %v530_v23 = vadd.f32 %v506_v4, %v428_v17  ;;  %v531_v1 = vadd.f32 %v507_v43, %v429_v38  ;;  %v977_v5 = vmul.u32 43690, %v972_v24  ;;  %v774_v27 = vadd.f32 %v1902_v56, %v744_v59  ;;  %1281 = vmatpush.bf16.msra.mxu1 %v1393_v16 }
 0x201   :  { %v2321_v26 = vmul.f32 %v1734_v50, %v382_v61  ;;  %v980_v10 = vshll.u32 %v2285_v46, 16  ;;  %vm2324_vm13 = vc.u32 %v974_v28, %v978_v13  ;;  %vm2328_vm14 = vcmp.eq.s32.totalorder %v1024_v58, 0  ;;  %v480_v34 = vpop.permute.xlu1 %479 }
 0x202   :  { %v587_v17 = vrot.slane %v530_v23, 7  ;;  %v589_v38 = vrot.slane %v531_v1, 7  ;;  %v660_v43 = vrot.slane %v530_v23, 1  ;;  %v662_v8 = vrot.slane %v531_v1, 1 }
 0x203   :  { %v775_v24 = vadd.f32 %v1904_v57, %v745_v39  ;;  %v514_v35 = vmul.f32 %v1853_v54, %v480_v34  ;;  %v515_v25 = vmul.f32 %v1855_v7, %v480_v34  ;;  %v964_v41 = vmul.u32 3, %v963_v62  ;;  %v1385_v39 = vld [vmem:[#allocation8 + $0x38] sm:$0xff] }
 0x204   :  { %v588_v15 = vsel %vm568_vm6, %v583_v53, %v587_v17  ;;  %v590_v45 = vsel %vm568_vm6, %v585_v37, %v589_v38  ;;  %v661_v3 = vsel %vm641_vm7, %v656_v19, %v660_v43  ;;  %v663_v2 = vsel %vm641_vm7, %v658_v40, %v662_v8  ;;  %1268 = vmatpush.bf16.msra.mxu0 %v1385_v39  ;;  %v1384_v17 = vld [vmem:[#allocation8 + $0x30] sm:$0xff] }
 0x205   :  { %v710_v59 = vsel %vm641_vm7, %v660_v43, %v530_v23  ;;  %v711_v49 = vsel %vm641_vm7, %v662_v8, %v531_v1  ;;  %v724_v4 = vmax.f32 %v588_v15, %v530_v23  ;;  %v725_v12 = vmax.f32 %v590_v45, %v531_v1  ;;  %v1392_v38 = vld [vmem:[#allocation8 + $0x70] sm:$0xff] }
 0x206   :  { %v746_v58 = vmax.f32 %v722_v36, %v661_v3  ;;  %v747_v11 = vmax.f32 %v723_v33, %v663_v2  ;;  %v2341_v34 = vadd.f32 %v514_v35, %v436_v44  ;;  %v2343_v62 = vadd.f32 %v515_v25, %v437_v52  ;;  %1282 = vmatpush.bf16.msra.mxu1 %v1392_v38  ;;  %v1383_v3 = vld [vmem:[#allocation8 + $0x28] sm:$0xff] }
 0x207   :  { %v2346_v53 = vmul.f32 %v1736_v51, %v382_v61  ;;  %v2348_v37 = vmax.f32 %v724_v4, %v710_v59  ;;  %v2350_v19 = vmax.f32 %v725_v12, %v711_v49  ;;  %v983_v40 = vsel %vm2324_vm13, 1, %v2565_v0  ;;  %v1391_v2 = vld [vmem:[#allocation8 + $0x68] sm:$0xff] }
 0x208   :  { %v798_v23 = vmax.f32 %v774_v27, 0.0  ;;  %v601_v36 = vrot.slane %v2341_v34, 7  ;;  %v603_v44 = vrot.slane %v2343_v62, 7  ;;  %v984_v33 = vadd.s32 %v978_v13, %v974_v28  ;;  %1269 = vmatpush.bf16.msra.mxu0 %v1384_v17 }
 0x209   :  { %v799_v52 = vmax.f32 %v775_v24, 0.0  ;;  %v674_v61 = vrot.slane %v2341_v34, 1  ;;  %v676_v1 = vrot.slane %v2343_v62, 1  ;;  %v965_v43 = vsub.s32 %v2105_v14, %v964_v41 }
 0x20a   :  { %v776_v8 = vadd.f32 %v1902_v56, %v746_v58  ;;  %v2602_v27 = vrot.slane %v2004_v18, 7  ;;  %v2603_v28 = vrot.slane %v2007_v60, 7  ;;  %v985_v24 = vadd.s32 %v983_v40, %v977_v5  ;;  %v386_v45 = vpop.permute.xlu1 %385  ;;  %1283 = vmatpush.bf16.msra.mxu1 %v1391_v2 }
 0x20b   :  { %v777_v35 = vadd.f32 %v1904_v57, %v747_v11  ;;  %v2604_v14 = vrot.slane %v2004_v18, 1  ;;  %v2605_v41 = vrot.slane %v2007_v60, 1  ;;  %v981_v5 = vshrl.u32 %v2285_v46, 16 }
 0x20c   :  { %v2366_v63 = vsel %vm568_vm6, %v2602_v27, %v601_v36  ;;  %v2373_v13 = vsel %vm568_vm6, %v2603_v28, %v603_v44  ;;  %v2606_v49 = vmax.f32 %v2038_v31, %v2004_v18  ;;  %v2607_v12 = vmax.f32 %v2043_v32, %v2007_v60  ;;  %1270 = vmatpush.bf16.msra.mxu0 %v1383_v3  ;;  %v1382_v60 = vld [vmem:[#allocation8 + $0x20] sm:$0xff] }
 0x20d   :  { %v675_v25 = vsel %vm641_vm7, %v2604_v14, %v674_v61  ;;  %v677_v15 = vsel %vm641_vm7, %v2605_v41, %v676_v1  ;;  %v732_v11 = vmax.f32 %v2366_v63, %v2341_v34  ;;  %v733_v59 = vmax.f32 %v2373_v13, %v2343_v62  ;;  %v1390_v32 = vld [vmem:[#allocation8 + $0x60] sm:$0xff] }
 0x20e   :  { %v754_v4 = vmax.f32 %v2606_v49, %v675_v25  ;;  %v755_v39 = vmax.f32 %v2607_v12, %v677_v15  ;;  %v1051_v16 = vsel %vm2328_vm14, %v798_v23, 0.0  ;;  %v1052_v46 = vsel %vm2328_vm14, %v799_v52, 0.0  ;;  %1284 = vmatpush.bf16.msra.mxu1 %v1390_v32 }
 0x20f   :  { %vm986_vm15 = vc.u32 %v984_v33, %v980_v10  ;;  %vm1001_vm0 = vcmp.ne.s32.totalorder %v965_v43, 0  ;;  %vm1007_vm1 = vcmp.lt.s32.totalorder %v965_v43, 0  ;;  %v800_v18 = vmax.f32 %v776_v8, 0.0 }
 0x210   :  { %v784_v58 = vadd.f32 %v1902_v56, %v754_v4  ;;  %v785_v40 = vadd.f32 %v1904_v57, %v755_v39  ;;  %v987_v17 = vsel %vm986_vm15, 1, %v2565_v0  ;;  %v801_v31 = vmax.f32 %v777_v35, 0.0  ;;  %vm1013_vm2 = vmand %vm1007_vm1, %vm1001_vm0  ;;  %1271 = vmatpush.bf16.msra.mxu0 %v1382_v60  ;;  %v2613_v39 = vld [vmem:[#allocation22_spill] sm:$0xff] }
 0x211   :  { %v989_v38 = vadd.s32 %v987_v17, %v985_v24  ;;  %v1019_v23 = vadd.s32 3, %v965_v43  ;;  %v1071_v10 = vadd.f32 %v2258_v6, %v1051_v16  ;;  %v1082_v33 = vadd.f32 %v2260_v9, %v1052_v46  ;;  %v2614_v16 = vld [vmem:[#allocation15_spill] sm:$0xff] }
 0x212   :  { %v808_v27 = vmax.f32 %v784_v58, 0.0  ;;  %v809_v52 = vmax.f32 %v785_v40, 0.0  ;;  %v337_v28 = vadd.f32 %v2123_v47, %v2113_v42  ;;  %v314_v0 = vmul.f32 %v1683_v21, %v2240_v55  ;;  %v2611_v21 = vld [vmem:[#allocation23_spill] sm:$0xff] }
 0x213   :  { %v2608_v8 = vshrl.u32 %v2273_v20, 16  ;;  %v1025_v14 = vsel %vm1013_vm2, %v1019_v23, %v965_v43  ;;  %v315_v24 = vmul.f32 %v1685_v22, %v2240_v55  ;;  %v1381_v20 = vld [vmem:[#allocation8 + $0x18] sm:$0xff]  ;;  %v438_v41 = vadd.f32 %v2321_v26, %v2612_v30  ;;  %v484_v3 = vpop.permute.xlu1 %483  ;;  %v2615_v26 = vld [vmem:[#allocation16_spill] sm:$0xff]  ;;  %v1386_v30 = vld [vmem:[#allocation8 + $0x40] sm:$0xff] }
 0x214   :  { %v1061_v25 = vsel %vm2236_vm8, %v808_v27, 0.0  ;;  %v1062_v6 = vsel %vm2236_vm8, %v809_v52, 0.0  ;;  %vm2418_vm3 = vcmp.eq.s32.totalorder %v1025_v14, 0  ;;  %v1389_v22 = vld [vmem:[#allocation8 + $0x58] sm:$0xff]  ;;  %v439_v15 = vadd.f32 %v2346_v53, %v337_v28  ;;  %1272 = vmatpush.bf16.msra.mxu0 %v1381_v20  ;;  %v1388_v23 = vld [vmem:[#allocation8 + $0x50] sm:$0xff] }
 0x215   :  { %v990_v35 = vadd.s32 %v989_v38, %v2608_v8  ;;  %v2423_v42 = vadd.f32 %v2095_v29, %v1061_v25  ;;  %v2426_v47 = vadd.f32 %v2611_v21, %v1062_v6  ;;  %v1053_v43 = vsel %vm2418_vm3, %v800_v18, 0.0  ;;  %1285 = vmatpush.bf16.msra.mxu1 %v1389_v22  ;;  %v2616_v28 = vld [vmem:[#allocation24_spill] sm:$0xff] }
 0x216   :  { %v2433_v2 = vadd.f32 %v1071_v10, %v1053_v43  ;;  %v1054_v29 = vsel %vm2418_vm3, %v801_v31, 0.0  ;;  %v516_v49 = vmul.f32 %v1853_v54, %v484_v3  ;;  %v517_v4 = vmul.f32 %v1855_v7, %v484_v3  ;;  %v1380_v31 = vld [vmem:[#allocation8 + $0x10] sm:$0xff] }
 0x217   :  { %v991_v55 = vadd.s32 %v990_v35, %v981_v5  ;;  %v2439_v5 = vadd.f32 %v1082_v33, %v1054_v29  ;;  %v236_v46 = vmul.f32 %v2614_v16, %v2613_v39  ;;  %v237_v58 = vmul.f32 %v2615_v26, %v2613_v39 }
 0x218   :  { %v416_v53 = vmul.f32 %v1734_v50, %v386_v45  ;;  %v417_v40 = vmul.f32 %v1736_v51, %v386_v45  ;;  %v2447_v17 = vadd.f32 %v516_v49, %v438_v41  ;;  %v2449_v18 = vadd.f32 %v517_v4, %v439_v15  ;;  %1273 = vmatpush.bf16.msra.mxu0 %v1380_v31 }
 0x219   :  { %v992_v12 = vshrl.u32 %v991_v55, 1  ;;  %v338_v32 = vadd.f32 %v314_v0, %v236_v46  ;;  %v339_v38 = vadd.f32 %v315_v24, %v237_v58  ;;  %v778_v51 = vadd.f32 %v1902_v56, %v2348_v37  ;;  %v1379_v24 = vld [vmem:[#allocation8 + $0x8] sm:$0xff]  ;;  %1286 = vmatpush.bf16.msra.mxu1 %v1388_v23 }
 0x21a   :  { %v605_v27 = vrot.slane %v2447_v17, 7  ;;  %v607_v52 = vrot.slane %v2449_v18, 7  ;;  %v678_v10 = vrot.slane %v2447_v17, 1  ;;  %v680_v50 = vrot.slane %v2449_v18, 1 }
 0x21b   :  { %v993_v60 = vmul.u32 3, %v992_v12  ;;  %v440_v45 = vadd.f32 %v416_v53, %v338_v32  ;;  %v441_v33 = vadd.f32 %v417_v40, %v339_v38  ;;  %v488_v21 = vpop.permute.xlu1 %487  ;;  %v779_v22 = vadd.f32 %v1904_v57, %v2350_v19 }
 0x21c   :  { %v606_v0 = vsel %vm568_vm6, %v601_v36, %v605_v27  ;;  %v608_v35 = vsel %vm568_vm6, %v603_v44, %v607_v52  ;;  %v679_v14 = vsel %vm641_vm7, %v674_v61, %v678_v10  ;;  %v681_v37 = vsel %vm641_vm7, %v676_v1, %v680_v50  ;;  %v1387_v61 = vld [vmem:[#allocation8 + $0x48] sm:$0xff]  ;;  %1274 = vmatpush.bf16.msra.mxu0 %v1379_v24 }
 0x21d   :  { %v994_v8 = vsub.s32 %v2616_v28, %v993_v60  ;;  %v734_v25 = vmax.f32 %v606_v0, %v2447_v17  ;;  %v735_v6 = vmax.f32 %v608_v35, %v2449_v18  ;;  %v756_v36 = vmax.f32 %v732_v11, %v679_v14  ;;  %1287 = vmatpush.bf16.msra.mxu1 %v1387_v61 }
 0x21e   :  { %v757_v44 = vmax.f32 %v733_v59, %v681_v37  ;;  %v518_v20 = vmul.f32 %v1853_v54, %v488_v21  ;;  %v519_v1 = vmul.f32 %v1855_v7, %v488_v21  ;;  %v1378_v54 = vld [vmem:[#allocation8] sm:$0xff]  ;;  %v802_v59 = vmax.f32 %v778_v51, 0.0 }
 0x21f   :  { %vm1002_vm4 = vcmp.ne.s32.totalorder %v994_v8, 0  ;;  %vm1008_vm5 = vcmp.lt.s32.totalorder %v994_v8, 0  ;;  %v786_v55 = vadd.f32 %v1902_v56, %v756_v36  ;;  %v1020_v62 = vadd.s32 3, %v994_v8 }
 0x220   :  { %v787_v34 = vadd.f32 %v1904_v57, %v757_v44  ;;  %vm2484_vm8 = vmand %vm1008_vm5, %vm1002_vm4  ;;  %v542_v13 = vadd.f32 %v518_v20, %v440_v45  ;;  %v543_v11 = vadd.f32 %v519_v1, %v441_v33  ;;  %v803_v49 = vmax.f32 %v779_v22, 0.0  ;;  %1275 = vmatpush.bf16.msra.mxu0 %v1378_v54 }
 0x221   :  { %v810_v7 = vmax.f32 %v786_v55, 0.0  ;;  %v1026_v19 = vsel %vm2484_vm8, %v1020_v62, %v994_v8  ;;  %1288 = vmatpush.bf16.msra.mxu1 %v1386_v30 }
 0x222   :  { %v811_v43 = vmax.f32 %v787_v34, 0.0  ;;  %v609_v41 = vrot.slane %v542_v13, 7  ;;  %v611_v15 = vrot.slane %v543_v11, 7  ;;  %v682_v3 = vrot.slane %v542_v13, 1 }
 0x223   :  { %v684_v29 = vrot.slane %v543_v11, 1  ;;  %v1063_v4 = vsel %vm2328_vm14, %v810_v7, 0.0  ;;  %vm2494_vm9 = vcmp.eq.s32.totalorder %v1026_v19, 0 }
 0x224   :  { %v1064_v12 = vsel %vm2328_vm14, %v811_v43, 0.0  ;;  %v610_v16 = vsel %vm568_vm6, %v605_v27, %v609_v41  ;;  %v612_v46 = vsel %vm568_vm6, %v607_v52, %v611_v15  ;;  %v683_v26 = vsel %vm641_vm7, %v678_v10, %v682_v3 }
 0x225   :  { %v685_v58 = vsel %vm641_vm7, %v680_v50, %v684_v29  ;;  %v712_v53 = vsel %vm641_vm7, %v682_v3, %v542_v13  ;;  %v713_v40 = vsel %vm641_vm7, %v684_v29, %v543_v11  ;;  %v736_v17 = vmax.f32 %v610_v16, %v542_v13 }
 0x226   :  { %v737_v48 = vmax.f32 %v612_v46, %v543_v11  ;;  %v758_v18 = vmax.f32 %v734_v25, %v683_v26  ;;  %v759_v31 = vmax.f32 %v735_v6, %v685_v58  ;;  %v1055_v60 = vsel %vm2494_vm9, %v802_v59, 0.0 }
 0x227   :  { %v1093_v32 = vadd.f32 %v2423_v42, %v1063_v4  ;;  %v760_v38 = vmax.f32 %v736_v17, %v712_v53  ;;  %v1073_v27 = vadd.f32 %v2433_v2, %v1055_v60  ;;  %v1056_v52 = vsel %vm2494_vm9, %v803_v49, 0.0  ;;  %v1443_v60 = vld [vmem:[%s2534_s4] ss:$0 sm:$0xff] }
 0x228   :  { %v761_v23 = vmax.f32 %v737_v48, %v713_v40  ;;  %v788_v10 = vadd.f32 %v1902_v56, %v758_v18  ;;  %v789_v50 = vadd.f32 %v1904_v57, %v759_v31  ;;  %v1084_v51 = vadd.f32 %v2439_v5, %v1056_v52 }
 0x229   :  { %v1104_v45 = vadd.f32 %v2426_v47, %v1064_v12  ;;  %v790_v33 = vadd.f32 %v1902_v56, %v760_v38  ;;  %v1074_v42 = vrot.slane %v1073_v27, 4  ;;  %vm1165_vm6 = vcmask 1041409  }
 0x22a   :  { %v791_v28 = vadd.f32 %v1904_v57, %v761_v23  ;;  %v812_v8 = vmax.f32 %v788_v10, 0.0  ;;  %v813_v0 = vmax.f32 %v789_v50, 0.0  ;;  %v1085_v35 = vrot.slane %v1084_v51, 4 }
 0x22b   :  { %v814_v2 = vmax.f32 %v790_v33, 0.0  ;;  %v1075_v37 = vadd.f32 %v1074_v42, %v1073_v27 }
 0x22c   :  { %v815_v14 = vmax.f32 %v791_v28, 0.0  ;;  %v1065_v24 = vsel %vm2418_vm3, %v812_v8, 0.0  ;;  %v1066_v25 = vsel %vm2418_vm3, %v813_v0, 0.0  ;;  %v1086_v5 = vadd.f32 %v1085_v35, %v1084_v51 }
 0x22d   :  { %v1067_v47 = vsel %vm2494_vm9, %v814_v2, 0.0  ;;  %v1076_v56 = vrot.slane %v1075_v37, 2  ;;  %v1094_v6 = vadd.f32 %v1093_v32, %v1065_v24  ;;  %v1105_v44 = vadd.f32 %v1104_v45, %v1066_v25 }
 0x22e   :  { %v1068_v57 = vsel %vm2494_vm9, %v815_v14, 0.0  ;;  %v1087_v36 = vrot.slane %v1086_v5, 2 }
 0x22f   :  { %v1077_v21 = vadd.f32 %v1076_v56, %v1075_v37  ;;  %v1095_v61 = vadd.f32 %v1094_v6, %v1067_v47  ;;  %v1106_v1 = vadd.f32 %v1105_v44, %v1068_v57 }
 0x230   :  { %v1088_v20 = vadd.f32 %v1087_v36, %v1086_v5 }
 0x231   :  { %v1078_v22 = vrot.slane %v1077_v21, 1  ;;  %v1096_v55 = vrot.slane %v1095_v61, 4  ;;  %v1107_v9 = vrot.slane %v1106_v1, 4 }
 0x232   :  { %v1089_v34 = vrot.slane %v1088_v20, 1 }
 0x233   :  { %v1097_v63 = vadd.f32 %v1096_v55, %v1095_v61  ;;  %v1108_v62 = vadd.f32 %v1107_v9, %v1106_v1  ;;  %v1079_v13 = vadd.f32 %v1078_v22, %v1077_v21 }
 0x234   :  { %v1090_v54 = vadd.f32 %v1089_v34, %v1088_v20 }
 0x235   :  { %v1098_v11 = vrot.slane %v1097_v63, 2  ;;  %v1109_v59 = vrot.slane %v1108_v62, 2  ;;  %v1113_v19 = vmul.f32 0.0625, %v1079_v13 }
 0x236   :  { %v1114_v15 = vmul.f32 0.0625, %v1090_v54 }
 0x237   :  { %v1099_v7 = vadd.f32 %v1098_v11, %v1097_v63  ;;  %v1110_v43 = vadd.f32 %v1109_v59, %v1108_v62  ;;  %v1117_v4 = vpack.c.bf16 %v1113_v19, %v1113_v19 }
 0x238   :  { %v1118_v39 = vpack.c.bf16 %v1114_v15, %v1114_v15 }
 0x239   :  { %v1100_v30 = vrot.slane %v1099_v7, 1  ;;  %v1111_v41 = vrot.slane %v1110_v43, 1  ;;  %v1161_v26 = vunpack.c.l.b16 %v1117_v4 }
 0x23a   :  { %v1162_v53 = vunpack.c.l.b16 %v1118_v39 }
 0x23b   :  { %v1101_v3 = vadd.f32 %v1100_v30, %v1099_v7  ;;  %v1112_v29 = vadd.f32 %v1111_v41, %v1110_v43 }
 0x23d   :  { %v1115_v49 = vmul.f32 0.0625, %v1101_v3  ;;  %v1116_v12 = vmul.f32 0.0625, %v1112_v29 }
 0x23f   :  { %v1119_v16 = vpack.c.bf16 %v1115_v49, %v1115_v49  ;;  %v1120_v46 = vpack.c.bf16 %v1116_v12, %v1116_v12 }
 0x241   :  { %v1163_v58 = vunpack.c.l.b16 %v1119_v16  ;;  %v1164_v40 = vunpack.c.l.b16 %v1120_v46 }
 0x243   :  { %v1166_v17 = vsel %vm1165_vm6, %v1163_v58, %v1161_v26  ;;  %v1167_v18 = vsel %vm1165_vm6, %v1164_v40, %v1162_v53 }
 0x244   :  { %v1168_v48 = vpack.c.b16 %v1166_v17, %v1166_v17  ;;  %v1169_v31 = vpack.c.b16 %v1167_v18, %v1167_v18 }
 0x246   :  { %1276 = vmatmul.bf16.vlgmr.msra.gmra.mxu0 %v1168_v48  ;;  %1289 = vmatmul.bf16.vlgmr.msra.gmra.mxu1 %v1169_v31 }
 0x2c3   :  { %v1277_v32 = vpop.f32.mrf.mxu0  ;;  %v1290_v23 = vpop.f32.mrf.mxu1 }
 0x2c4   :  { %v1278_v38 = vadd.f32 %v1443_v60, %v1277_v32 }
 0x2c6   :  { %v1291_v27 = vadd.f32 %v1290_v23, %v1278_v38 }
 0x2c8   :  { %1294 = vst [vmem:[#allocation10] sm:$0x3] %v1291_v27 }
 0x2c9   :  { %1305 = dma.vmem_to_hbm [thread:$0]  %s1301_s14, 32, %s1303_s17, [#allocation4]  }
 0x2cb   :  { %v1279_v52 = vpop.f32.mrf.mxu0  ;;  %v1292_v10 = vpop.f32.mrf.mxu1 }
 0x2cc   :  { %1570 = dma.done.wait [#allocation4], 32  }
 0x2cd   :  { %1571 = vsyncadd [#allocation4], 4294967264 }
 0x2ce   :  { %1310 = vsyncpa [#allocation3], 1 }
 0x2cf   :  { %1311 = vsyncpa [#allocation6], 1 }
 0x2d0   :  { %1312 = vsyncpa [#allocation9], 1 }
 0x2d1   :  { %1313 = vsyncpa [#allocation4], 1 }

</bundles_post_ra>
